<compile_context>
chip_gen: v7x
topology: tpu7x:2x2x1
jax: 0.10.0
libtpu: 0.0.40
codegen_flags: <defaults>
</compile_context>

<pallas_src>
import functools

import jax
import jax.numpy as jnp
import numpy as np
from jax.experimental import pallas as pl
from jax.experimental.pallas import tpu as pltpu


def make_freq_tables(d_model: int):
    """inv_freq[j] = 50^(-2j/d_half), phase[j] = 0 (even j) / pi/2 (odd j).

    Computed in float64 then cast to f32 (same precision as the torch buffer).
    Shapes are (d_half, 1) columns to match the transposed in-kernel layout.
    """
    d_half = d_model // 2
    j = np.arange(d_half, dtype=np.float64)
    inv_freq = np.power(50.0, -2.0 * j / d_half)
    phase = np.where(j % 2 == 0, 0.0, np.pi / 2.0)  # sin(a + pi/2) == cos(a)
    return (jnp.asarray(inv_freq, jnp.float32).reshape(d_half, 1),
            jnp.asarray(phase, jnp.float32).reshape(d_half, 1))


def _frac_encoder_kernel(x_ref, inv_freq_ref, phase_ref, out_ref, *,
                         resolution: int, log10: bool):
    x = x_ref[...]                                    # (1, TILE_N) f32, lane-dense
    if log10:
        x = 0.0025 * jnp.square(jnp.log2(x))
        x = jnp.where(x > 1.0, jnp.float32(1.0), x)
    inv_res = jnp.float32(1.0 / resolution)
    x = jnp.where(x < inv_res, inv_res, x)
    # torch.round / jnp.round both round half-to-even. Keep idx in f32 (exact <= 2^24),
    # avoiding int<->float conversions.
    idx = jnp.round(x * jnp.float32(resolution)) - jnp.float32(1.0)
    # Out-of-table x would be an index error in torch; clamp to the valid range
    # (matches jnp's clamped gather used in the reference).
    idx = jnp.clip(idx, 0.0, jnp.float32(resolution - 1))
    # (d_half, 1) * (1, TILE_N) -> (d_half, TILE_N); phase folds the even/odd sin/cos.
    angle = inv_freq_ref[...] * idx + phase_ref[...]
    out_ref[...] = jnp.sin(angle)                     # EUP; unmasked full-lane store


def _round_up(a: int, b: int) -> int:
    return (a + b - 1) // b * b


def fractional_encoder(x: jnp.ndarray, inv_freq: jnp.ndarray, phase: jnp.ndarray, *,
                       resolution: int, log10: bool = False,
                       tile_n: int = 4096) -> jnp.ndarray:
    orig_shape = x.shape
    d_half = inv_freq.shape[0]
    n = int(x.size)

    xf = jnp.reshape(x, (1, n)).astype(jnp.float32)   # lane-dense scalar row
    tile = _round_up(min(tile_n, _round_up(n, 128)), 128)
    n_pad = _round_up(n, tile)
    if n_pad != n:
        xf = jnp.pad(xf, ((0, 0), (0, n_pad - n)), constant_values=1.0)

    kernel = functools.partial(_frac_encoder_kernel,
                               resolution=resolution, log10=log10)
    out_t = pl.pallas_call(
        kernel,
        out_shape=jax.ShapeDtypeStruct((d_half, n_pad), jnp.float32),
        grid=(n_pad // tile,),
        in_specs=[
            pl.BlockSpec((1, tile), lambda i: (0, i)),        # x, tiled over N
            pl.BlockSpec((d_half, 1), lambda i: (0, 0)),      # inv_freq, resident
            pl.BlockSpec((d_half, 1), lambda i: (0, 0)),      # phase, resident
        ],
        out_specs=pl.BlockSpec((d_half, tile), lambda i: (0, i)),
        compiler_params=pltpu.CompilerParams(
            dimension_semantics=("parallel",)),               # megacore on v7x
    )(xf, inv_freq, phase)

    # Transpose back to (N, d_half) outside the kernel (layout plumbing only).
    out = out_t[:, :n].T
    return out.reshape(*orig_shape, d_half)


def _reference(x, d_model, resolution, log10=False):
    """Numpy reference of the PyTorch forward: gather from an (exact) float64 pe table.

    Index math is done in float32 to match the kernel/torch bit-for-bit.
    """
    d_half = d_model // 2
    x = np.asarray(x, np.float32)
    if log10:
        x = (np.float32(0.0025) * np.square(np.log2(x))).astype(np.float32)
        x = np.where(x > 1.0, np.float32(1.0), x)
    x = np.where(x < np.float32(1.0 / resolution), np.float32(1.0 / resolution), x)
    idx = np.rint((x * np.float32(resolution)).astype(np.float32)).astype(np.int64) - 1
    idx = np.clip(idx, 0, resolution - 1)
    r = np.arange(resolution, dtype=np.float64)[:, None]
    j = np.arange(d_half, dtype=np.float64)[None, :]
    angle = r / np.power(50.0, 2.0 * j / d_half)
    pe = np.where((np.arange(d_half)[None, :] % 2) == 0, np.sin(angle), np.cos(angle))
    return pe[idx].astype(np.float32)


if __name__ == "__main__":
    d_model = 32          # -> d_half = 16 encoding dims
    resolution = 5000
    batch, seq = 2, 8     # x: (batch, seq) fractional element amounts in (0, 1]

    inv_freq, phase = make_freq_tables(d_model)

    key = jax.random.PRNGKey(0)
    x = jax.random.uniform(key, (batch, seq), dtype=jnp.float32,
                           minval=1e-4, maxval=1.0)

    ok = True
    for log10 in (False, True):
        out = fractional_encoder(x, inv_freq, phase,
                                 resolution=resolution, log10=log10)
        out = jax.block_until_ready(out)
        ref = _reference(np.asarray(x), d_model, resolution, log10=log10)
        assert out.shape == (batch, seq, d_model // 2)
        # Tolerance note: with resolution=5000 the angles reach ~5e3 rad, so f32 rounding
        # of idx*inv_freq alone limits agreement with an exact-f64 table to ~1e-3 (the
        # torch f32 buffer carries the same inherent noise); 5e-3 still catches any
        # index/phase bug.
        err = np.max(np.abs(np.asarray(out) - ref))
        ok = ok and np.allclose(np.asarray(out), ref, atol=5e-3, rtol=0.0)
        assert ok, (log10, err)

    print("KERNEL_OK")
</pallas_src>

<mosaic_0001>
module attributes {stable_mosaic.version = 11 : i64} {
  func.func @_frac_encoder_kernel(%arg0: i32, %arg1: memref<1x128xf32, #tpu.memory_space<vmem>>, %arg2: memref<16x1xf32, #tpu.memory_space<vmem>>, %arg3: memref<16x1xf32, #tpu.memory_space<vmem>>, %arg4: memref<16x128xf32, #tpu.memory_space<vmem>>) attributes {dimension_semantics = [#tpu.dimension_semantics<parallel>], iteration_bounds = array<i64: 1>, scalar_prefetch = 0 : i64, scratch_operands = 0 : i64, tpu.core_type = #tpu.core_type<tc>, window_params = [{transform_indices = @transform_0, window_bounds = array<i64: 1, 128>}, {pipeline_mode = #tpu.pipeline_mode<synchronous>, transform_indices = @transform_1, window_bounds = array<i64: 16, 1>}, {pipeline_mode = #tpu.pipeline_mode<synchronous>, transform_indices = @transform_2, window_bounds = array<i64: 16, 1>}, {transform_indices = @transform_3, window_bounds = array<i64: 16, 128>}]} {
    %c0 = arith.constant 0 : index
    %c0_0 = arith.constant 0 : index
    %0 = vector.load %arg1[%c0, %c0_0] : memref<1x128xf32, #tpu.memory_space<vmem>>, vector<1x128xf32>
    %cst = arith.constant 2.000000e-04 : f32
    %1 = vector.broadcast %cst : f32 to vector<1x128xf32>
    %2 = arith.cmpf olt, %0, %1 : vector<1x128xf32>
    %cst_1 = arith.constant 2.000000e-04 : f32
    %3 = vector.broadcast %cst_1 : f32 to vector<1x128xf32>
    %4 = arith.select %2, %3, %0 : vector<1x128xi1>, vector<1x128xf32>
    %cst_2 = arith.constant 5.000000e+03 : f32
    %5 = vector.broadcast %cst_2 : f32 to vector<1x128xf32>
    %6 = arith.mulf %4, %5 : vector<1x128xf32>
    %7 = math.roundeven %6 : vector<1x128xf32>
    %cst_3 = arith.constant 1.000000e+00 : f32
    %8 = vector.broadcast %cst_3 : f32 to vector<1x128xf32>
    %9 = arith.subf %7, %8 : vector<1x128xf32>
    %cst_4 = arith.constant 0.000000e+00 : f32
    %cst_5 = arith.constant 4.999000e+03 : f32
    %10 = vector.broadcast %cst_4 : f32 to vector<1x128xf32>
    %11 = arith.maximumf %10, %9 : vector<1x128xf32>
    %12 = vector.broadcast %cst_5 : f32 to vector<1x128xf32>
    %13 = arith.minimumf %12, %11 : vector<1x128xf32>
    %c0_6 = arith.constant 0 : index
    %c0_7 = arith.constant 0 : index
    %14 = vector.load %arg2[%c0_6, %c0_7] : memref<16x1xf32, #tpu.memory_space<vmem>>, vector<16x1xf32>
    %15 = vector.broadcast %14 : vector<16x1xf32> to vector<16x128xf32>
    %16 = vector.broadcast %13 : vector<1x128xf32> to vector<16x128xf32>
    %17 = arith.mulf %15, %16 : vector<16x128xf32>
    %c0_8 = arith.constant 0 : index
    %c0_9 = arith.constant 0 : index
    %18 = vector.load %arg3[%c0_8, %c0_9] : memref<16x1xf32, #tpu.memory_space<vmem>>, vector<16x1xf32>
    %19 = vector.broadcast %18 : vector<16x1xf32> to vector<16x128xf32>
    %20 = arith.addf %17, %19 : vector<16x128xf32>
    %21 = math.sin %20 : vector<16x128xf32>
    %c0_10 = arith.constant 0 : index
    %c0_11 = arith.constant 0 : index
    %22 = vector.load %arg4[%c0_10, %c0_11] : memref<16x128xf32, #tpu.memory_space<vmem>>, vector<16x128xf32>
    tpu.vector_store %arg4[%c0_10, %c0_11], %21 {strides = array<i32>} : memref<16x128xf32, #tpu.memory_space<vmem>>, vector<16x128xf32>,
    return
  }
  func.func @transform_0(%arg0: i32) -> (i32, i32) {
    %c0_i32 = arith.constant 0 : i32
    %c0_i32_0 = arith.constant 0 : i32
    return %c0_i32, %arg0 : i32, i32
  }
  func.func @transform_1(%arg0: i32) -> (i32, i32) {
    %c0_i32 = arith.constant 0 : i32
    %c0_i32_0 = arith.constant 0 : i32
    %c0_i32_1 = arith.constant 0 : i32
    return %c0_i32, %c0_i32_0 : i32, i32
  }
  func.func @transform_2(%arg0: i32) -> (i32, i32) {
    %c0_i32 = arith.constant 0 : i32
    %c0_i32_0 = arith.constant 0 : i32
    %c0_i32_1 = arith.constant 0 : i32
    return %c0_i32, %c0_i32_0 : i32, i32
  }
  func.func @transform_3(%arg0: i32) -> (i32, i32) {
    %c0_i32 = arith.constant 0 : i32
    %c0_i32_0 = arith.constant 0 : i32
    return %c0_i32, %arg0 : i32, i32
  }
}

</mosaic_0001>

<bundles_post_ra>
// kernel: tpu_custom_call.1
= control target key start
LH: loop header
LB: loop body
LE: loop exit
PB: predicated region body
PF: predicated region fallthrough
CT: control target
= control target key end

     0   :  { %v345_v2 = vmov 0   ;;  %s470_s0 = inlined_call_operand.vmem [shape: f32[1,128], index: 0, kind: input, shape index: {}]   ;;  %s471_s1 = inlined_call_operand.vmem [shape: f32[16,1], index: 1, kind: input, shape index: {}]   ;;  %s472_s2 = inlined_call_operand.vmem [shape: f32[16,1], index: 2, kind: input, shape index: {}]   ;;  %s473_s3 = inlined_call_operand.hbm [shape: f32[16,128], index: 3, kind: output, shape index: {}]  }
   0x1   :  { %v43_v0 = vld [vmem:[%s472_s2] sm:$0xff]  ;;  %312 = vset.pattern.permute.xlu1 %v345_v2  ;;  %311 = vset.pattern.permute.xlu0 %v345_v2  ;;  %v44_v3 = vld [vmem:[%s472_s2 + $0x8] sm:$0xff] }
   0x2   :  { %v23_v1 = vld [vmem:[%s471_s1] sm:$0xff]  ;;  %47 = vperm.xlu1 %312, %v43_v0   ;;  %v24_v4 = vld [vmem:[%s471_s1 + $0x8] sm:$0xff] }
   0x3   :  { %27 = vperm.xlu0 %311, %v23_v1  }
   0x4   :  { %8 = vsyncpa [#allocation3], 0  ;;  %v15_v5 = vld [vmem:[%s470_s0] sm:$0x1]  ;;  %v36_v9 = vlaneseq  ;;  %v346_v40 = vmov 683565275  }
   0x5   :  { %vm16_vm0 = vcmp.lt.f32.partialorder %v15_v5, 0.0002  ;;  %v347_v44 = vmov 2475754826   ;;  %v348_v46 = vmov 2131351028  }
   0x6   :  { %52 = vperm.xlu1 %312, %v44_v3   ;;  %v17_v6 = vsel %vm16_vm0, 0.0002, %v15_v5  ;;  %v37_v11 = vshrl.u32 %v36_v9, 7  ;;  %v349_v48 = vmov 2102212464   ;;  %s352_s0 = smov [#allocation2]  }
   0x7   :  { %32 = vperm.xlu0 %311, %v24_v4   ;;  %v18_v7 = vmul.f32 5000.0, %v17_v6  ;;  %v350_v50 = vmov 920167782   ;;  %v351_v57 = vmov 1326507024   ;;  %s272_s1 = sshll.u32 %s352_s0, 4  ;;  %s273_s1 = int_to_ptr.vmem [resolvable:$true] %s272_s1 }
   0x8   :  { %v38_v13 = vsub.s32 0, %v37_v11  ;;  %s321_s2 = scalar_lea.vmem %s273_s1, 256  ;;  %p326_p1 = scmp.lt.s32.totalorder %s273_s1, %s273_s1 }
   0x9   :  { %v292_v8 = vround.rtne.f32 %v18_v7  ;;  %p322_p0 = scmp.ne.s32.totalorder %s273_s1, %s321_s2  ;;  %p327_p2 = scmp.lt.s32.totalorder %s321_s2, %s321_s2 }
   0xb   :  { %v283_v10 = vadd.f32 -1.0, %v292_v8  ;;  %p328_p3 = por %p327_p2, %p326_p1 }
   0xd   :  { %v21_v12 = vmax.f32 %v283_v10, 0.0  ;;  %p329_p4 = pnand %p328_p3, %p322_p0 }
   0xf   :  { %v22_v14 = vmin.f32 %v21_v12, 4999.0 }
  0x11   :  { %v39_v15 = vrot.slane %v22_v14, %v38_v13 }
  0x81   :  { %v48_v16 = vpop.permute.xlu1 %47 }
  0x82   :  { %v28_v17 = vpop.permute.xlu0 %27 }
  0x83   :  { %v41_v18 = vmul.f32 %v39_v15, %v28_v17 }
  0x85   :  { %v390_v19 = vadd.f32 %v48_v16, %v41_v18  ;;  %v53_v24 = vpop.permute.xlu1 %52 }
  0x86   :  { %v33_v20 = vpop.permute.xlu0 %32 }
  0x87   :  { %v57_v21 = vand.u32 2147483647, %v390_v19  ;;  %v60_v22 = vand.u32 2139095040, %v390_v19  ;;  %v42_v23 = vmul.f32 %v39_v15, %v33_v20  ;;  %vm59_vm15 = vcmp.lt.s32.totalorder %v390_v19, 0 }
  0x89   :  { %v61_v25 = vshrl.u32 %v60_v22, 23  ;;  %v394_v26 = vadd.f32 %v53_v24, %v42_v23  ;;  %v64_v27 = vand.u32 8388607, %v57_v21  ;;  %vm58_vm0 = vcmp.le.f32.partialorder %v57_v21, 0.7853982 }
  0x8b   :  { %v284_v28 = vadd.s32 4294967169, %v61_v25  ;;  %v164_v29 = vand.u32 2139095040, %v394_v26  ;;  %v65_v31 = vor.u32 8388608, %v64_v27  ;;  %v161_v33 = vand.u32 2147483647, %v394_v26 }
  0x8d   :  { %v67_v30 = vadd.s32 1, %v284_v28  ;;  %v165_v32 = vshrl.u32 %v164_v29, 23  ;;  %v400_v38 = vshll.u32 %v65_v31, 8  ;;  %v168_v42 = vand.u32 8388607, %v161_v33 }
  0x8f   :  { %vm68_vm1 = vcmp.gt.s32.totalorder %v67_v30, 0  ;;  %v288_v35 = vadd.s32 4294967169, %v165_v32  ;;  %v169_v8 = vor.u32 8388608, %v168_v42 }
  0x90   :  { %v69_v34 = vsel %vm68_vm1, %v67_v30, 0  ;;  %vm163_vm1 = vcmp.lt.s32.totalorder %v394_v26, 0 }
  0x91   :  { %v70_v36 = vshrl.u32 %v69_v34, 5  ;;  %v71_v37 = vand.u32 31, %v69_v34  ;;  %v171_v43 = vadd.s32 1, %v288_v35  ;;  %v209_v23 = vshll.u32 %v169_v8, 8 }
  0x93   :  { %v72_v39 = vsub.s32 32, %v71_v37  ;;  %v74_v41 = vshll.u32 %v346_v40, %v71_v37  ;;  %v77_v45 = vshll.u32 %v347_v44, %v71_v37  ;;  %v80_v47 = vshll.u32 %v348_v46, %v71_v37 }
  0x94   :  { %v83_v49 = vshll.u32 %v349_v48, %v71_v37  ;;  %v86_v51 = vshll.u32 %v350_v50, %v71_v37  ;;  %vm89_vm2 = vcmp.lt.s32.totalorder %v70_v36, 1  ;;  %vm91_vm3 = vcmp.lt.s32.totalorder %v70_v36, 3 }
  0x95   :  { %v75_v52 = vshrl.u32 %v347_v44, %v72_v39  ;;  %v78_v53 = vshrl.u32 %v348_v46, %v72_v39  ;;  %v81_v54 = vshrl.u32 %v349_v48, %v72_v39  ;;  %v73_v55 = vshrl.u32 %v346_v40, %v72_v39 }
  0x96   :  { %v84_v56 = vshrl.u32 %v350_v50, %v72_v39  ;;  %v87_v58 = vshrl.u32 %v351_v57, %v72_v39  ;;  %vm172_vm4 = vcmp.gt.s32.totalorder %v171_v43, 0  ;;  %vm92_vm5 = vcmp.lt.s32.totalorder %v70_v36, 4 }
  0x97   :  { %v76_v59 = vor.u32 %v75_v52, %v74_v41  ;;  %v79_v60 = vor.u32 %v78_v53, %v77_v45  ;;  %v82_v61 = vor.u32 %v81_v54, %v80_v47  ;;  %v173_v0 = vsel %vm172_vm4, %v171_v43, 0 }
  0x98   :  { %v85_v62 = vor.u32 %v84_v56, %v83_v49  ;;  %v88_v63 = vor.u32 %v87_v58, %v86_v51  ;;  %vm90_vm6 = vcmp.lt.s32.totalorder %v70_v36, 2  ;;  %v175_v11 = vand.u32 31, %v173_v0 }
  0x99   :  { %v93_v1 = vsel %vm89_vm2, %v73_v55, %v76_v59  ;;  %v94_v2 = vsel %vm92_vm5, %v82_v61, 2102212464  ;;  %v97_v3 = vsel %vm89_vm2, %v76_v59, %v79_v60  ;;  %v101_v4 = vsel %vm89_vm2, %v79_v60, %v82_v61 }
  0x9a   :  { %v95_v5 = vsel %vm91_vm3, %v79_v60, %v94_v2  ;;  %v98_v6 = vsel %vm92_vm5, %v85_v62, 920167782  ;;  %v102_v7 = vsel %vm92_vm5, %v88_v63, 1326507024  ;;  %v174_v20 = vshrl.u32 %v173_v0, 5 }
  0x9b   :  { %v99_v9 = vsel %vm91_vm3, %v82_v61, %v98_v6  ;;  %v103_v10 = vsel %vm91_vm3, %v85_v62, %v102_v7  ;;  %v96_v12 = vsel %vm90_vm6, %v93_v1, %v95_v5  ;;  %v176_v22 = vsub.s32 32, %v175_v11 }
  0x9c   :  { %v100_v13 = vsel %vm90_vm6, %v97_v3, %v99_v9  ;;  %v104_v14 = vsel %vm90_vm6, %v101_v4, %v103_v10  ;;  %v112_v24 = vmul.u32 %v400_v38, %v96_v12  ;;  %v178_v25 = vshll.u32 %v346_v40, %v175_v11 }
  0x9d   :  { %v413_v15 = vmul.u32.u64.low %v400_v38, %v104_v14  ;;  %v414_v16 = vmul.u32.u64.high %v400_v38, %v104_v14, %v413_v15  ;;  %v417_v17 = vmul.u32.u64.low %v400_v38, %v100_v13  ;;  %v418_v18 = vmul.u32.u64.high %v400_v38, %v100_v13, %v417_v17 }
  0x9e   :  { %v181_v27 = vshll.u32 %v347_v44, %v175_v11  ;;  %v184_v28 = vshll.u32 %v348_v46, %v175_v11  ;;  %v179_v29 = vshrl.u32 %v347_v44, %v176_v22  ;;  %v182_v30 = vshrl.u32 %v348_v46, %v176_v22 }
  0x9f   :  { %v185_v31 = vshrl.u32 %v349_v48, %v176_v22  ;;  %v187_v32 = vshll.u32 %v349_v48, %v175_v11  ;;  %vm114_vm7 = vc.u32 %v414_v16, %v417_v17  ;;  %v115_v34 = vadd.s32 1, %v418_v18 }
  0xa0   :  { %v188_v35 = vshrl.u32 %v350_v50, %v176_v22  ;;  %v190_v36 = vshll.u32 %v350_v50, %v175_v11  ;;  %v180_v37 = vor.u32 %v179_v29, %v178_v25  ;;  %v183_v39 = vor.u32 %v182_v30, %v181_v27 }
  0xa1   :  { %v186_v41 = vor.u32 %v185_v31, %v184_v28  ;;  %v191_v42 = vshrl.u32 %v351_v57, %v176_v22  ;;  %v116_v38 = vsel %vm114_vm7, %v115_v34, %v418_v18  ;;  %vm193_vm8 = vcmp.lt.s32.totalorder %v174_v20, 1 }
  0xa2   :  { %v189_v43 = vor.u32 %v188_v35, %v187_v32  ;;  %vm196_vm9 = vcmp.lt.s32.totalorder %v174_v20, 4  ;;  %v117_v44 = vadd.s32 %v116_v38, %v112_v24  ;;  %vm195_vm10 = vcmp.lt.s32.totalorder %v174_v20, 3 }
  0xa3   :  { %v192_v45 = vor.u32 %v191_v42, %v190_v36  ;;  %v198_v46 = vsel %vm196_vm9, %v186_v41, 2102212464  ;;  %v177_v47 = vshrl.u32 %v346_v40, %v176_v22  ;;  %v201_v48 = vsel %vm193_vm8, %v180_v37, %v183_v39 }
  0xa4   :  { %v202_v49 = vsel %vm196_vm9, %v189_v43, 920167782  ;;  %v205_v51 = vsel %vm193_vm8, %v183_v39, %v186_v41  ;;  %v118_v52 = vadd.s32 536870912, %v117_v44  ;;  %vm194_vm11 = vcmp.lt.s32.totalorder %v174_v20, 2 }
  0xa5   :  { %v203_v50 = vsel %vm195_vm10, %v186_v41, %v202_v49  ;;  %v206_v53 = vsel %vm196_vm9, %v192_v45, 1326507024  ;;  %v197_v54 = vsel %vm193_vm8, %v177_v47, %v180_v37  ;;  %v199_v55 = vsel %vm195_vm10, %v183_v39, %v198_v46 }
  0xa6   :  { %v204_v56 = vsel %vm194_vm11, %v201_v48, %v203_v50  ;;  %v207_v57 = vsel %vm195_vm10, %v189_v43, %v206_v53  ;;  %v119_v58 = vshrl.u32 %v118_v52, 30  ;;  %v200_v0 = vsel %vm194_vm11, %v197_v54, %v199_v55 }
  0xa7   :  { %v208_v59 = vsel %vm194_vm11, %v205_v51, %v207_v57  ;;  %v428_v60 = vmul.u32.u64.low %v209_v23, %v204_v56  ;;  %v429_v61 = vmul.u32.u64.high %v209_v23, %v204_v56, %v428_v60  ;;  %v216_v3 = vmul.u32 %v209_v23, %v200_v0 }
  0xa8   :  { %v431_v62 = vmul.u32.u64.low %v209_v23, %v208_v59  ;;  %v432_v63 = vmul.u32.u64.high %v209_v23, %v208_v59, %v431_v62  ;;  %v120_v40 = vshll.u32 %v119_v58, 30  ;;  %v113_v15 = vadd.s32 %v417_v17, %v414_v16 }
  0xa9   :  { %v219_v2 = vadd.s32 1, %v429_v61  ;;  %v143_v37 = vsub.s32 4, %v119_v58  ;;  %vm447_vm2 = vcmp.le.f32.partialorder %v161_v33, 0.7853982  ;;  %vm149_vm6 = vweird.f32 %v390_v19 }
  0xaa   :  { %v121_v1 = vsub.s32 %v117_v44, %v120_v40  ;;  %vm218_vm12 = vc.u32 %v432_v63, %v428_v60  ;;  %v217_v16 = vadd.s32 %v428_v60, %v432_v63  ;;  %vm253_vm10 = vweird.f32 %v394_v26 }
  0xab   :  { %v220_v5 = vsel %vm218_vm12, %v219_v2, %v429_v61  ;;  %v144_v46 = vsel %vm59_vm15, %v143_v37, %v119_v58 }
  0xac   :  { %v123_v4 = vsub.s32 0, %v121_v1  ;;  %v221_v6 = vadd.s32 %v220_v5, %v216_v3  ;;  %v146_v52 = vsel %vm58_vm0, 0, %v144_v46 }
  0xad   :  { %v150_v54 = vadd.s32 3, %v146_v52 }
  0xae   :  { %v285_v7 = vmin.u32 %v123_v4, %v121_v1  ;;  %v222_v8 = vadd.s32 536870912, %v221_v6 }
  0xaf   :  { %v151_v59 = vand.u32 3, %v150_v54 }
  0xb0   :  { %v125_v9 = vclz %v285_v7  ;;  %v223_v10 = vshrl.u32 %v222_v8, 30 }
  0xb1   :  { %vm156_vm3 = vcmp.eq.s32.totalorder %v151_v59, 2  ;;  %vm153_vm4 = vcmp.eq.s32.totalorder %v151_v59, 0  ;;  %vm152_vm5 = vcmp.lt.s32.totalorder %v151_v59, 2 }
  0xb2   :  { %v286_v11 = vadd.s32 4294967294, %v125_v9  ;;  %v224_v12 = vshll.u32 %v223_v10, 30  ;;  %v247_v56 = vsub.s32 4, %v223_v10 }
  0xb4   :  { %vm287_vm13 = vcmp.lt.s32.totalorder %v286_v11, 0  ;;  %v225_v14 = vsub.s32 %v221_v6, %v224_v12  ;;  %v248_v60 = vsel %vm163_vm1, %v247_v56, %v223_v10 }
  0xb5   :  { %v128_v13 = vsel %vm287_vm13, 0, %v286_v11 }
  0xb6   :  { %v129_v18 = vsub.s32 32, %v128_v13  ;;  %v133_v20 = vsub.s32 4294967266, %v128_v13  ;;  %v227_v22 = vsub.s32 0, %v225_v14  ;;  %v130_v23 = vshll.u32 %v121_v1, %v128_v13 }
  0xb7   :  { %v250_v1 = vsel %vm447_vm2, 0, %v248_v60 }
  0xb8   :  { %v131_v24 = vshrl.u32 %v113_v15, %v129_v18  ;;  %v134_v25 = vadd.s32 127, %v133_v20  ;;  %v289_v27 = vmin.u32 %v227_v22, %v225_v14  ;;  %v254_v4 = vadd.s32 3, %v250_v1 }
  0xba   :  { %v132_v28 = vor.u32 %v131_v24, %v130_v23  ;;  %v135_v29 = vshll.u32 %v134_v25, 23  ;;  %v229_v30 = vclz %v289_v27  ;;  %v255_v6 = vand.u32 3, %v254_v4 }
  0xbc   :  { %v136_v31 = vor.u32 4788187, %v135_v29  ;;  %v290_v32 = vadd.s32 4294967294, %v229_v30  ;;  %v139_v35 = vcvt.s32.f32 %v132_v28  ;;  %vm260_vm7 = vcmp.eq.s32.totalorder %v255_v6, 2 }
  0xbd   :  { %vm257_vm8 = vcmp.eq.s32.totalorder %v255_v6, 0  ;;  %vm256_vm9 = vcmp.lt.s32.totalorder %v255_v6, 2 }
  0xbe   :  { %v137_v34 = vand.u32 2147483647, %v136_v31  ;;  %vm291_vm14 = vcmp.lt.s32.totalorder %v290_v32, 0 }
  0xbf   :  { %v232_v39 = vsel %vm291_vm14, 0, %v290_v32 }
  0xc0   :  { %v140_v36 = vmul.f32 %v139_v35, %v137_v34  ;;  %v233_v17 = vsub.s32 32, %v232_v39  ;;  %v237_v41 = vsub.s32 4294967266, %v232_v39  ;;  %v234_v38 = vshll.u32 %v225_v14, %v232_v39 }
  0xc2   :  { %v141_v42 = vxor.u32 2147483648, %v140_v36  ;;  %v235_v43 = vshrl.u32 %v217_v16, %v233_v17  ;;  %v238_v44 = vadd.s32 127, %v237_v41 }
  0xc4   :  { %v142_v45 = vsel %vm59_vm15, %v141_v42, %v140_v36  ;;  %v236_v48 = vor.u32 %v235_v43, %v234_v38  ;;  %v239_v49 = vshll.u32 %v238_v44, 23 }
  0xc5   :  { %v145_v47 = vsel %vm58_vm0, %v390_v19, %v142_v45 }
  0xc6   :  { %313 = vcosq.f32 %v145_v47  ;;  %v240_v51 = vor.u32 4788187, %v239_v49  ;;  %v243_v53 = vcvt.s32.f32 %v236_v48 }
  0xc7   :  { %315 = vsinq.f32 %v145_v47 }
  0xc8   :  { %v241_v50 = vand.u32 2147483647, %v240_v51 }
  0xca   :  { %v244_v55 = vmul.f32 %v243_v53, %v241_v50 }
  0xcc   :  { %v245_v57 = vxor.u32 2147483648, %v244_v55 }
  0xce   :  { %v246_v58 = vsel %vm163_vm1, %v245_v57, %v244_v55 }
  0xcf   :  { %v249_v62 = vsel %vm447_vm2, %v394_v26, %v246_v58 }
  0xd0   :  { %v314_v61 = vpop.eup %313  ;;  %317 = vcosq.f32 %v249_v62 }
  0xd1   :  { %v316_v63 = vpop.eup %315  ;;  %v157_v40 = vxor.u32 2147483648, %v314_v61  ;;  %319 = vsinq.f32 %v249_v62 }
  0xd2   :  { %v154_v0 = vxor.u32 2147483648, %v316_v63 }
  0xd3   :  { %v158_v33 = vsel %vm156_vm3, %v157_v40, %v316_v63 }
  0xd4   :  { %v155_v2 = vsel %vm153_vm4, %v314_v61, %v154_v0 }
  0xd5   :  { %v159_v3 = vsel %vm152_vm5, %v155_v2, %v158_v33 }
  0xd6   :  { %v160_v5 = vsel %vm149_vm6, nan, %v159_v3 }
  0xd7   :  { %265 = vst [vmem:[#allocation2] sm:$0xff] %v160_v5 }
  0xda   :  { %v318_v7 = vpop.eup %317 }
  0xdb   :  { %v320_v8 = vpop.eup %319  ;;  %v261_v9 = vxor.u32 2147483648, %v318_v7 }
  0xdc   :  { %v258_v10 = vxor.u32 2147483648, %v320_v8 }
  0xdd   :  { %v262_v11 = vsel %vm260_vm7, %v261_v9, %v320_v8 }
  0xde   :  { %v259_v12 = vsel %vm257_vm8, %v318_v7, %v258_v10 }
  0xdf   :  { %v263_v13 = vsel %vm256_vm9, %v259_v12, %v262_v11 }
  0xe0   :  { %v264_v19 = vsel %vm253_vm10, nan, %v263_v13 }
  0xe1   :  { %266 = vst [vmem:[#allocation2 + $0x8] sm:$0xff] %v264_v19 }
  0xe2   :  { %332 = shalt.err (!%p329_p4)
}
  0xe3   :  { %s333_s24 = scalar_lea.hbm %s473_s3, 256 }
  0xe4   :  { %p334_p5 = scmp.ne.s32.totalorder %s473_s3, %s333_s24  ;;  %p337_p6 = scmp.lt.u32.totalorder %s333_s24, %s473_s3 }
  0xe6   :  { %p339_p7 = pnand %p337_p6, %p334_p5 }
  0xe8   :  { %342 = shalt.err (!%p339_p7)
}
  0xe9   :  { %s353_s29 = smov 128   ;;  %s354_s30 = smov 8  }
  0xea   :  { %278 = dma.vmem_to_hbm [thread:$0]  %s273_s1, 256, %s473_s3, [#allocation3], %s353_s29, %s353_s29, %s354_s30  }
  0xeb   :  { %343 = dma.done.wait [#allocation3], 256  }
  0xec   :  { %344 = vsyncadd [#allocation3], 4294967040 }
  0xed   :  { %282 = vsyncpa [#allocation3], 1 }

</bundles_post_ra>
